<compile_context>
chip_gen: v5e
topology: v5e:2x2
jax: 0.10.0
libtpu: 0.0.40
codegen_flags: <defaults>
</compile_context>

<pallas_src>
import jax
import jax.numpy as jnp
from jax.experimental import pallas as pl
from jax.experimental.pallas import tpu as pltpu

LANE = 128
MAX_BATCH_TILE = 2048  # multiple of 256; VMEM footprint stays at a few MiB


def _round_up(n, m):
    return ((n + m - 1) // m) * m


def _mlp_kernel(xt_ref, w1t_ref, b1t_ref, w2t_ref, b2t_ref, w3t_ref, b3t_ref, ot_ref):
    # Transposed orientation: batch on the lane axis -> lane-dense stores.
    xt = xt_ref[...]                                                   # (Fin,  BM)
    h1 = jnp.dot(w1t_ref[...], xt, preferred_element_type=jnp.float32)
    h1 = jnp.maximum(h1 + b1t_ref[...], 0.0)                           # (128,  BM)
    h2 = jnp.dot(w2t_ref[...], h1, preferred_element_type=jnp.float32)
    h2 = jnp.maximum(h2 + b2t_ref[...], 0.0)                           # (128,  BM)
    ot_ref[...] = (
        jnp.dot(w3t_ref[...], h2, preferred_element_type=jnp.float32) + b3t_ref[...]
    )                                                                  # (Fout, BM)


def prepare_params(params):
    """One-time repack of the tiny weights into kernel layout (padded + transposed).

    Call once and reuse; this keeps the per-call forward free of the 6+ small
    pad/cast/reshape XLA ops flagged by the perf review.
    Input convention: w* stored as (in_features, out_features), b* as (out,).
    """
    w1, b1 = params["w1"], params["b1"]          # (Fin, H1), (H1,)
    w2, b2 = params["w2"], params["b2"]          # (H1,  H2), (H2,)
    w3, b3 = params["w3"], params["b3"]          # (H2, Fout), (Fout,)

    Fin, H1 = w1.shape
    H2 = w2.shape[1]
    Fout = w3.shape[1]
    H1p, H2p = _round_up(H1, LANE), _round_up(H2, LANE)

    f32 = jnp.float32
    w1t = jnp.zeros((H1p, Fin), f32).at[:H1, :].set(w1.T.astype(f32))      # (128, Fin)
    b1t = jnp.zeros((H1p, 1), f32).at[:H1, 0].set(b1.astype(f32))          # (128, 1)
    w2t = jnp.zeros((H2p, H1p), f32).at[:H2, :H1].set(w2.T.astype(f32))    # (128, 128)
    b2t = jnp.zeros((H2p, 1), f32).at[:H2, 0].set(b2.astype(f32))          # (128, 1)
    w3t = jnp.zeros((Fout, H2p), f32).at[:, :H2].set(w3.T.astype(f32))     # (Fout, 128)
    b3t = b3.reshape(Fout, 1).astype(f32)                                  # (Fout, 1)
    return {"w1t": w1t, "b1t": b1t, "w2t": w2t, "b2t": b2t, "w3t": w3t, "b3t": b3t}


@jax.jit
def classification_model_forward(data, prepared):
    """data: (B, in_features) float32; prepared: output of prepare_params()."""
    w1t, b1t = prepared["w1t"], prepared["b1t"]
    w2t, b2t = prepared["w2t"], prepared["b2t"]
    w3t, b3t = prepared["w3t"], prepared["b3t"]

    B, Fin = data.shape
    H1p = w1t.shape[0]
    H2p = w2t.shape[0]
    Fout = w3t.shape[0]

    # Batch tile: full-dim single tile for small B; otherwise a lane-aligned
    # multiple-of-256 tile chosen so the grid has >= 2 steps (both v7x TCs
    # busy) while amortizing per-step overhead (tile up to 2048 rows).
    if B <= 256:
        BM = B
    else:
        BM = min(MAX_BATCH_TILE, _round_up(-(-B // 2), 256))
    grid = (pl.cdiv(B, BM),)

    xt = data.astype(jnp.float32).T               # (Fin, B): batch -> lane axis

    const = lambda shape: pl.BlockSpec(shape, lambda i: (0, 0))

    out_t = pl.pallas_call(
        _mlp_kernel,
        out_shape=jax.ShapeDtypeStruct((Fout, B), jnp.float32),
        grid=grid,
        in_specs=[
            pl.BlockSpec((Fin, BM), lambda i: (0, i)),   # activations tiled over batch
            const((H1p, Fin)),                           # weights/biases stay
            const((H1p, 1)),                             # VMEM-resident across
            const((H2p, H1p)),                           # the whole grid
            const((H2p, 1)),
            const((Fout, H2p)),
            const((Fout, 1)),
        ],
        out_specs=pl.BlockSpec((Fout, BM), lambda i: (0, i)),   # lane-dense output
        compiler_params=pltpu.CompilerParams(
            dimension_semantics=("parallel",),           # megacore on v7x
        ),
    )(xt, w1t, b1t, w2t, b2t, w3t, b3t)

    return out_t.T                                # (B, Fout)


def init_params(key, in_features, out_features, hidden=10):
    """Deterministic init mimicking PyTorch's U(-1/sqrt(fan_in), 1/sqrt(fan_in))."""
    ks = jax.random.split(key, 6)

    def linear(kw, kb, fan_in, fan_out):
        bound = 1.0 / jnp.sqrt(jnp.float32(fan_in))
        w = jax.random.uniform(kw, (fan_in, fan_out), jnp.float32, -bound, bound)
        b = jax.random.uniform(kb, (fan_out,), jnp.float32, -bound, bound)
        return w, b

    w1, b1 = linear(ks[0], ks[1], in_features, hidden)
    w2, b2 = linear(ks[2], ks[3], hidden, hidden)
    w3, b3 = linear(ks[4], ks[5], hidden, out_features)
    return {"w1": w1, "b1": b1, "w2": w2, "b2": b2, "w3": w3, "b3": b3}


def _reference_forward(data, p):
    h1 = jnp.maximum(data @ p["w1"] + p["b1"], 0.0)
    h2 = jnp.maximum(h1 @ p["w2"] + p["b2"], 0.0)
    return h2 @ p["w3"] + p["b3"]


if __name__ == "__main__":
    key = jax.random.PRNGKey(0)
    k_data, k_params, k_data2 = jax.random.split(key, 3)

    # Moon dataset: 2 input features, binary classification -> 1 output logit.
    batch, in_features, out_features = 64, 2, 1
    data = jax.random.normal(k_data, (batch, in_features), dtype=jnp.float32)
    params = init_params(k_params, in_features, out_features)
    prepared = prepare_params(params)   # one-time weight repack (hoisted out of forward)

    out = jax.block_until_ready(classification_model_forward(data, prepared))
    ref = _reference_forward(data, params)
    assert out.shape == (batch, out_features), out.shape
    assert jnp.allclose(out, ref, atol=1e-4, rtol=1e-4), (out, ref)

    # Also exercise the multi-tile path (grid of 2, BM=512, ragged last tile).
    batch2 = 777
    data2 = jax.random.normal(k_data2, (batch2, in_features), dtype=jnp.float32)
    out2 = jax.block_until_ready(classification_model_forward(data2, prepared))
    ref2 = _reference_forward(data2, params)
    assert out2.shape == (batch2, out_features), out2.shape
    assert jnp.allclose(out2, ref2, atol=1e-4, rtol=1e-4)

    print("KERNEL_OK")
</pallas_src>

<mosaic_0001>
module attributes {stable_mosaic.version = 11 : i64} {
  func.func @_mlp_kernel(%arg0: i32, %arg1: memref<2x64xf32, #tpu.memory_space<vmem>>, %arg2: memref<128x2xf32, #tpu.memory_space<vmem>>, %arg3: memref<128x1xf32, #tpu.memory_space<vmem>>, %arg4: memref<128x128xf32, #tpu.memory_space<vmem>>, %arg5: memref<128x1xf32, #tpu.memory_space<vmem>>, %arg6: memref<1x128xf32, #tpu.memory_space<vmem>>, %arg7: memref<1x1xf32, #tpu.memory_space<vmem>>, %arg8: memref<1x64xf32, #tpu.memory_space<vmem>>) attributes {dimension_semantics = [#tpu.dimension_semantics<parallel>], iteration_bounds = array<i64: 1>, scalar_prefetch = 0 : i64, scratch_operands = 0 : i64, tpu.core_type = #tpu.core_type<tc>, window_params = [{transform_indices = @transform_0, window_bounds = array<i64: 2, 64>}, {pipeline_mode = #tpu.pipeline_mode<synchronous>, transform_indices = @transform_1, window_bounds = array<i64: 128, 2>}, {pipeline_mode = #tpu.pipeline_mode<synchronous>, transform_indices = @transform_2, window_bounds = array<i64: 128, 1>}, {pipeline_mode = #tpu.pipeline_mode<synchronous>, transform_indices = @transform_3, window_bounds = array<i64: 128, 128>}, {pipeline_mode = #tpu.pipeline_mode<synchronous>, transform_indices = @transform_4, window_bounds = array<i64: 128, 1>}, {pipeline_mode = #tpu.pipeline_mode<synchronous>, transform_indices = @transform_5, window_bounds = array<i64: 1, 128>}, {pipeline_mode = #tpu.pipeline_mode<synchronous>, transform_indices = @transform_6, window_bounds = array<i64: 1, 1>}, {transform_indices = @transform_7, window_bounds = array<i64: 1, 64>}]} {
    %c0 = arith.constant 0 : index
    %c0_0 = arith.constant 0 : index
    %0 = vector.load %arg1[%c0, %c0_0] : memref<2x64xf32, #tpu.memory_space<vmem>>, vector<2x64xf32>
    %c0_1 = arith.constant 0 : index
    %c0_2 = arith.constant 0 : index
    %1 = vector.load %arg2[%c0_1, %c0_2] : memref<128x2xf32, #tpu.memory_space<vmem>>, vector<128x2xf32>
    %cst = arith.constant dense<0.000000e+00> : vector<128x64xf32>
    %2 = tpu.matmul %1, %0, %cst {dimension_numbers = #tpu.dot_dimension_numbers<[1], [0], [0], [1], [0, 0, 1, 1], [], []>} : vector<128x2xf32>, vector<2x64xf32>, vector<128x64xf32> -> vector<128x64xf32>
    %c0_3 = arith.constant 0 : index
    %c0_4 = arith.constant 0 : index
    %3 = vector.load %arg3[%c0_3, %c0_4] : memref<128x1xf32, #tpu.memory_space<vmem>>, vector<128x1xf32>
    %4 = vector.broadcast %3 : vector<128x1xf32> to vector<128x64xf32>
    %5 = arith.addf %2, %4 : vector<128x64xf32>
    %cst_5 = arith.constant 0.000000e+00 : f32
    %6 = vector.broadcast %cst_5 : f32 to vector<128x64xf32>
    %7 = arith.maximumf %5, %6 : vector<128x64xf32>
    %c0_6 = arith.constant 0 : index
    %c0_7 = arith.constant 0 : index
    %8 = vector.load %arg4[%c0_6, %c0_7] : memref<128x128xf32, #tpu.memory_space<vmem>>, vector<128x128xf32>
    %cst_8 = arith.constant dense<0.000000e+00> : vector<128x64xf32>
    %9 = tpu.matmul %8, %7, %cst_8 {dimension_numbers = #tpu.dot_dimension_numbers<[1], [0], [0], [1], [0, 0, 1, 1], [], []>} : vector<128x128xf32>, vector<128x64xf32>, vector<128x64xf32> -> vector<128x64xf32>
    %c0_9 = arith.constant 0 : index
    %c0_10 = arith.constant 0 : index
    %10 = vector.load %arg5[%c0_9, %c0_10] : memref<128x1xf32, #tpu.memory_space<vmem>>, vector<128x1xf32>
    %11 = vector.broadcast %10 : vector<128x1xf32> to vector<128x64xf32>
    %12 = arith.addf %9, %11 : vector<128x64xf32>
    %cst_11 = arith.constant 0.000000e+00 : f32
    %13 = vector.broadcast %cst_11 : f32 to vector<128x64xf32>
    %14 = arith.maximumf %12, %13 : vector<128x64xf32>
    %c0_12 = arith.constant 0 : index
    %c0_13 = arith.constant 0 : index
    %15 = vector.load %arg6[%c0_12, %c0_13] : memref<1x128xf32, #tpu.memory_space<vmem>>, vector<1x128xf32>
    %cst_14 = arith.constant dense<0.000000e+00> : vector<1x64xf32>
    %16 = tpu.matmul %15, %14, %cst_14 {dimension_numbers = #tpu.dot_dimension_numbers<[1], [0], [0], [1], [0, 0, 1, 1], [], []>} : vector<1x128xf32>, vector<128x64xf32>, vector<1x64xf32> -> vector<1x64xf32>
    %c0_15 = arith.constant 0 : index
    %c0_16 = arith.constant 0 : index
    %17 = vector.load %arg7[%c0_15, %c0_16] : memref<1x1xf32, #tpu.memory_space<vmem>>, vector<1x1xf32>
    %18 = vector.broadcast %17 : vector<1x1xf32> to vector<1x64xf32>
    %19 = arith.addf %16, %18 : vector<1x64xf32>
    %c0_17 = arith.constant 0 : index
    %c0_18 = arith.constant 0 : index
    %20 = vector.load %arg8[%c0_17, %c0_18] : memref<1x64xf32, #tpu.memory_space<vmem>>, vector<1x64xf32>
    tpu.vector_store %arg8[%c0_17, %c0_18], %19 {strides = array<i32>} : memref<1x64xf32, #tpu.memory_space<vmem>>, vector<1x64xf32>,
    return
  }
  func.func @transform_0(%arg0: i32) -> (i32, i32) {
    %c0_i32 = arith.constant 0 : i32
    %c0_i32_0 = arith.constant 0 : i32
    return %c0_i32, %arg0 : i32, i32
  }
  func.func @transform_1(%arg0: i32) -> (i32, i32) {
    %c0_i32 = arith.constant 0 : i32
    %c0_i32_0 = arith.constant 0 : i32
    %c0_i32_1 = arith.constant 0 : i32
    return %c0_i32, %c0_i32_0 : i32, i32
  }
  func.func @transform_2(%arg0: i32) -> (i32, i32) {
    %c0_i32 = arith.constant 0 : i32
    %c0_i32_0 = arith.constant 0 : i32
    %c0_i32_1 = arith.constant 0 : i32
    return %c0_i32, %c0_i32_0 : i32, i32
  }
  func.func @transform_3(%arg0: i32) -> (i32, i32) {
    %c0_i32 = arith.constant 0 : i32
    %c0_i32_0 = arith.constant 0 : i32
    %c0_i32_1 = arith.constant 0 : i32
    return %c0_i32, %c0_i32_0 : i32, i32
  }
  func.func @transform_4(%arg0: i32) -> (i32, i32) {
    %c0_i32 = arith.constant 0 : i32
    %c0_i32_0 = arith.constant 0 : i32
    %c0_i32_1 = arith.constant 0 : i32
    return %c0_i32, %c0_i32_0 : i32, i32
  }
  func.func @transform_5(%arg0: i32) -> (i32, i32) {
    %c0_i32 = arith.constant 0 : i32
    %c0_i32_0 = arith.constant 0 : i32
    %c0_i32_1 = arith.constant 0 : i32
    return %c0_i32, %c0_i32_0 : i32, i32
  }
  func.func @transform_6(%arg0: i32) -> (i32, i32) {
    %c0_i32 = arith.constant 0 : i32
    %c0_i32_0 = arith.constant 0 : i32
    %c0_i32_1 = arith.constant 0 : i32
    return %c0_i32, %c0_i32_0 : i32, i32
  }
  func.func @transform_7(%arg0: i32) -> (i32, i32) {
    %c0_i32 = arith.constant 0 : i32
    %c0_i32_0 = arith.constant 0 : i32
    return %c0_i32, %arg0 : i32, i32
  }
}

</mosaic_0001>

<bundles_post_ra>
// kernel: classification_model_forward.1
= control target key start
LH: loop header
LB: loop body
LE: loop exit
PB: predicated region body
PF: predicated region fallthrough
CT: control target
= control target key end

     0   :  { %s860_s0 = inlined_call_operand.vmem [shape: f32[2,64], index: 0, kind: input, shape index: {}]   ;;  %s861_s1 = inlined_call_operand.vmem [shape: f32[128,2], index: 1, kind: input, shape index: {}]   ;;  %s862_s2 = inlined_call_operand.vmem [shape: f32[128,1], index: 2, kind: input, shape index: {}]   ;;  %s863_s3 = inlined_call_operand.vmem [shape: f32[128,128], index: 3, kind: input, shape index: {}]   ;;  %s864_s4 = inlined_call_operand.vmem [shape: f32[128,1], index: 4, kind: input, shape index: {}]   ;;  %s865_s5 = inlined_call_operand.vmem [shape: f32[1,128], index: 5, kind: input, shape index: {}]   ;;  %s866_s6 = inlined_call_operand.<no memory space> [shape: f32[1,1], index: 6, kind: input, shape index: {}]   ;;  %s867_s7 = inlined_call_operand.hbm [shape: f32[1,64], index: 7, kind: output, shape index: {}]  }
   0x1   :  { %v12_v0 = vstv %s866_s6 }
   0x2   :  { %13 = vst [vmem:[#allocation2] sm:$0x1] %v12_v0 }
   0x3   :  { %v29_v1 = vld [vmem:[%s860_s0] sm:$0x3]  ;;  %vm191_vm0 = vcmask 1041408   ;;  %v61_v2 = vld [vmem:[%s862_s2 + $0x78] sm:$0xff]  ;;  %v59_v3 = vld [vmem:[%s862_s2 + $0x68] sm:$0xff]  ;;  %v580_v4 = vmov 0  }
   0x4   :  { %552 = vset.pattern.permute.xlu1 %v580_v4  ;;  %551 = vset.pattern.permute.xlu0 %v580_v4  ;;  %v30_v5 = vld [vmem:[%s861_s1] sm:$0xff]  ;;  %vm142_vm1 = vcmask 15360   ;;  %v41_v6 = vld [vmem:[%s861_s1 + $0x58] sm:$0xff]  ;;  %v60_v8 = vld [vmem:[%s862_s2 + $0x70] sm:$0xff] }
   0x5   :  { %515 = vmatpush.msk.msra.mxu0 %vm191_vm0, %v29_v1  ;;  %532 = vmatpush.msk.msra.mxu2 %vm191_vm0, %v29_v1  ;;  %v57_v7 = vld [vmem:[%s862_s2 + $0x58] sm:$0xff]  ;;  %v58_v9 = vld [vmem:[%s862_s2 + $0x60] sm:$0xff] }
   0x6   :  { %139 = vperm.xlu0 %551, %v61_v2   ;;  %129 = vperm.xlu1 %552, %v59_v3  }
   0x7   :  { %516 = vmatmul.msk.f32.vlgmr.msra.gmra.mxu0 %vm142_vm1, %v30_v5  ;;  %527 = vmatmul.msk.f32.vlgmr.msra.gmra.mxu2 %vm142_vm1, %v41_v6 }
   0x8   :  { %553 = vset.pattern.permute.xlu2 %v580_v4 }
   0x9   :  { %119 = vperm.xlu2 %553, %v57_v7  }
   0xa   :  { %14 = vsyncpa [#allocation4], 0  ;;  %v31_v10 = vld [vmem:[%s861_s1 + $0x8] sm:$0xff]  ;;  %v42_v11 = vld [vmem:[%s861_s1 + $0x60] sm:$0xff]  ;;  %s581_s25 = smov [#allocation3]   ;;  %s506_s29 = sshll.u32 %s867_s7, 4  ;;  %s507_s29 = int_to_ptr.hbm [resolvable:$true] %s506_s29 }
   0xb   :  { %v56_v12 = vld [vmem:[%s862_s2 + $0x50] sm:$0xff]  ;;  %v55_v13 = vld [vmem:[%s862_s2 + $0x48] sm:$0xff]  ;;  %v54_v14 = vld [vmem:[%s862_s2 + $0x40] sm:$0xff]  ;;  %s504_s26 = sshll.u32 %s581_s25, 4  ;;  %vm497_vm2 = vcmask 516096   ;;  %s505_s26 = int_to_ptr.vmem [resolvable:$true] %s504_s26 }
   0xc   :  { %v32_v15 = vld [vmem:[%s861_s1 + $0x10] sm:$0xff]  ;;  %v43_v16 = vld [vmem:[%s861_s1 + $0x68] sm:$0xff]  ;;  %v53_v17 = vld [vmem:[%s862_s2 + $0x38] sm:$0xff] }
   0xd   :  { %v52_v18 = vld [vmem:[%s862_s2 + $0x30] sm:$0xff]  ;;  %v51_v19 = vld [vmem:[%s862_s2 + $0x28] sm:$0xff]  ;;  %v33_v20 = vld [vmem:[%s861_s1 + $0x18] sm:$0xff] }
   0xe   :  { %134 = vperm.xlu0 %551, %v60_v8   ;;  %124 = vperm.xlu1 %552, %v58_v9   ;;  %v44_v21 = vld [vmem:[%s861_s1 + $0x70] sm:$0xff]  ;;  %v50_v22 = vld [vmem:[%s862_s2 + $0x20] sm:$0xff]  ;;  %v49_v23 = vld [vmem:[%s862_s2 + $0x18] sm:$0xff] }
   0xf   :  { %517 = vmatmul.msk.f32.gmra.mxu0 %vm142_vm1, %v31_v10  ;;  %528 = vmatmul.msk.f32.gmra.mxu2 %vm142_vm1, %v42_v11  ;;  %v48_v24 = vld [vmem:[%s862_s2 + $0x10] sm:$0xff]  ;;  %v34_v25 = vld [vmem:[%s861_s1 + $0x20] sm:$0xff]  ;;  %v45_v26 = vld [vmem:[%s861_s1 + $0x78] sm:$0xff] }
  0x10   :  { %v47_v27 = vld [vmem:[%s862_s2 + $0x8] sm:$0xff]  ;;  %v307_v28 = vld [vmem:[%s864_s4 + $0x78] sm:$0xff]  ;;  %v46_v29 = vld [vmem:[%s862_s2] sm:$0xff] }
  0x11   :  { %114 = vperm.xlu2 %553, %v56_v12   ;;  %v35_v30 = vld [vmem:[%s861_s1 + $0x28] sm:$0xff]  ;;  %v306_v31 = vld [vmem:[%s864_s4 + $0x70] sm:$0xff]  ;;  %v304_v32 = vld [vmem:[%s864_s4 + $0x60] sm:$0xff] }
  0x12   :  { %v305_v33 = vld [vmem:[%s864_s4 + $0x68] sm:$0xff]  ;;  %v36_v34 = vld [vmem:[%s861_s1 + $0x30] sm:$0xff]  ;;  %v303_v35 = vld [vmem:[%s864_s4 + $0x58] sm:$0xff] }
  0x13   :  { %v301_v36 = vld [vmem:[%s864_s4 + $0x48] sm:$0xff]  ;;  %v302_v37 = vld [vmem:[%s864_s4 + $0x50] sm:$0xff]  ;;  %v37_v38 = vld [vmem:[%s861_s1 + $0x38] sm:$0xff] }
  0x14   :  { %v300_v39 = vld [vmem:[%s864_s4 + $0x40] sm:$0xff]  ;;  %v298_v40 = vld [vmem:[%s864_s4 + $0x30] sm:$0xff]  ;;  %v299_v41 = vld [vmem:[%s864_s4 + $0x38] sm:$0xff] }
  0x15   :  { %v38_v42 = vld [vmem:[%s861_s1 + $0x40] sm:$0xff]  ;;  %v297_v43 = vld [vmem:[%s864_s4 + $0x28] sm:$0xff]  ;;  %v295_v44 = vld [vmem:[%s864_s4 + $0x18] sm:$0xff] }
  0x16   :  { %109 = vperm.xlu0 %551, %v55_v13   ;;  %104 = vperm.xlu1 %552, %v54_v14   ;;  %v296_v45 = vld [vmem:[%s864_s4 + $0x20] sm:$0xff]  ;;  %v39_v46 = vld [vmem:[%s861_s1 + $0x48] sm:$0xff]  ;;  %v294_v47 = vld [vmem:[%s864_s4 + $0x10] sm:$0xff] }
  0x17   :  { %518 = vmatmul.msk.f32.gmra.mxu0 %vm142_vm1, %v32_v15  ;;  %529 = vmatmul.msk.f32.gmra.mxu2 %vm142_vm1, %v43_v16  ;;  %v292_v48 = vld [vmem:[%s864_s4] sm:$0xff]  ;;  %v293_v49 = vld [vmem:[%s864_s4 + $0x8] sm:$0xff]  ;;  %v40_v50 = vld [vmem:[%s861_s1 + $0x50] sm:$0xff] }
  0x18   :  { %v470_v51 = vld [vmem:[#allocation2] sm:$0x1] }
  0x19   :  { %99 = vperm.xlu2 %553, %v53_v17  }
  0x1e   :  { %94 = vperm.xlu0 %551, %v52_v18   ;;  %89 = vperm.xlu1 %552, %v51_v19  }
  0x1f   :  { %519 = vmatmul.msk.f32.gmra.mxu0 %vm142_vm1, %v33_v20  ;;  %530 = vmatmul.msk.f32.gmra.mxu2 %vm142_vm1, %v44_v21 }
  0x21   :  { %84 = vperm.xlu2 %553, %v50_v22  }
  0x26   :  { %79 = vperm.xlu0 %551, %v49_v23   ;;  %74 = vperm.xlu1 %552, %v48_v24  }
  0x27   :  { %520 = vmatmul.msk.f32.gmra.mxu0 %vm142_vm1, %v34_v25  ;;  %531 = vmatmul.msk.f32.gmra.mxu2 %vm142_vm1, %v45_v26 }
  0x29   :  { %69 = vperm.xlu2 %553, %v47_v27  }
  0x2e   :  { %385 = vperm.xlu1 %552, %v307_v28   ;;  %64 = vperm.xlu0 %551, %v46_v29  }
  0x2f   :  { %521 = vmatmul.msk.f32.gmra.mxu0 %vm142_vm1, %v35_v30 }
  0x31   :  { %380 = vperm.xlu2 %553, %v306_v31  }
  0x36   :  { %370 = vperm.xlu1 %552, %v304_v32   ;;  %375 = vperm.xlu0 %551, %v305_v33  }
  0x37   :  { %522 = vmatmul.msk.f32.gmra.mxu0 %vm142_vm1, %v36_v34 }
  0x39   :  { %365 = vperm.xlu2 %553, %v303_v35  }
  0x3e   :  { %355 = vperm.xlu1 %552, %v301_v36   ;;  %360 = vperm.xlu0 %551, %v302_v37  }
  0x3f   :  { %523 = vmatmul.msk.f32.gmra.mxu0 %vm142_vm1, %v37_v38 }
  0x41   :  { %350 = vperm.xlu2 %553, %v300_v39  }
  0x46   :  { %340 = vperm.xlu1 %552, %v298_v40   ;;  %345 = vperm.xlu0 %551, %v299_v41  }
  0x47   :  { %524 = vmatmul.msk.f32.gmra.mxu0 %vm142_vm1, %v38_v42 }
  0x49   :  { %335 = vperm.xlu2 %553, %v297_v43  }
  0x4e   :  { %325 = vperm.xlu1 %552, %v295_v44   ;;  %330 = vperm.xlu0 %551, %v296_v45  }
  0x4f   :  { %525 = vmatmul.msk.f32.gmra.mxu0 %vm142_vm1, %v39_v46 }
  0x51   :  { %320 = vperm.xlu2 %553, %v294_v47  }
  0x56   :  { %310 = vperm.xlu1 %552, %v292_v48   ;;  %315 = vperm.xlu0 %551, %v293_v49  }
  0x57   :  { %526 = vmatmul.msk.f32.gmra.mxu0 %vm142_vm1, %v40_v50 }
  0x59   :  { %473 = vperm.xlu2 %553, %v470_v51  }
  0x63   :  { %v120_v10 = vpop.permute.xlu2 %119 }
  0x6b   :  { %v115_v16 = vpop.permute.xlu2 %114 }
  0x73   :  { %v100_v21 = vpop.permute.xlu2 %99 }
  0x78   :  { %v140_v59 = vpop.permute.xlu0 %139  ;;  %v130_v60 = vpop.permute.xlu1 %129 }
  0x7b   :  { %v85_v29 = vpop.permute.xlu2 %84 }
  0x80   :  { %v135_v63 = vpop.permute.xlu0 %134  ;;  %v125_v4 = vpop.permute.xlu1 %124 }
  0x83   :  { %v70_v42 = vpop.permute.xlu2 %69 }
  0x84   :  { %v788_v52 = vpop.f32.mrf.mxu0 }
  0x88   :  { %v110_v18 = vpop.permute.xlu0 %109  ;;  %v105_v19 = vpop.permute.xlu1 %104 }
  0x8a   :  { %v245_v53 = vpop.f32.mrf.mxu2 }
  0x8b   :  { %v246_v11 = vadd.f32 %v245_v53, %v120_v10  ;;  %v276_v53 = vld [vmem:[%s863_s3] sm:$0xff] }
  0x8c   :  { %v790_v54 = vpop.f32.mrf.mxu0 }
  0x8d   :  { %v271_v14 = vmax.f32 %v246_v11, 0.0  ;;  %v216_v46 = vadd.f32 %v790_v54, %v70_v42  ;;  %v284_v54 = vld [vmem:[%s863_s3 + $0x40] sm:$0xff] }
  0x8f   :  { %v261_v50 = vmax.f32 %v216_v46, 0.0 }
  0x90   :  { %v95_v22 = vpop.permute.xlu0 %94  ;;  %v90_v26 = vpop.permute.xlu1 %89 }
  0x92   :  { %v248_v55 = vpop.f32.mrf.mxu2 }
  0x93   :  { %v249_v6 = vadd.f32 %v248_v55, %v125_v4  ;;  %v285_v55 = vld [vmem:[%s863_s3 + $0x48] sm:$0xff] }
  0x94   :  { %v792_v56 = vpop.f32.mrf.mxu0 }
  0x95   :  { %v272_v12 = vmax.f32 %v249_v6, 0.0 }
  0x98   :  { %v80_v32 = vpop.permute.xlu0 %79  ;;  %v75_v39 = vpop.permute.xlu1 %74 }
  0x99   :  { %v219_v43 = vadd.f32 %v792_v56, %v75_v39  ;;  %v278_v56 = vld [vmem:[%s863_s3 + $0x10] sm:$0xff] }
  0x9a   :  { %v251_v57 = vpop.f32.mrf.mxu2 }
  0x9b   :  { %v252_v2 = vadd.f32 %v251_v57, %v130_v60  ;;  %v262_v48 = vmax.f32 %v219_v43, 0.0  ;;  %v286_v57 = vld [vmem:[%s863_s3 + $0x50] sm:$0xff]  ;;  %v280_v60 = vld [vmem:[%s863_s3 + $0x20] sm:$0xff] }
  0x9c   :  { %v794_v58 = vpop.f32.mrf.mxu0 }
  0x9d   :  { %v273_v9 = vmax.f32 %v252_v2, 0.0  ;;  %v222_v40 = vadd.f32 %v794_v58, %v80_v32  ;;  %v279_v58 = vld [vmem:[%s863_s3 + $0x18] sm:$0xff] }
  0x9e   :  { %v283_v2 = vld [vmem:[%s863_s3 + $0x38] sm:$0xff] }
  0x9f   :  { %v263_v47 = vmax.f32 %v222_v40, 0.0 }
  0xa0   :  { %v65_v45 = vpop.permute.xlu0 %64 }
  0xa1   :  { %v213_v49 = vadd.f32 %v788_v52, %v65_v45  ;;  %v277_v52 = vld [vmem:[%s863_s3 + $0x8] sm:$0xff] }
  0xa2   :  { %v254_v61 = vpop.f32.mrf.mxu2 }
  0xa3   :  { %v255_v0 = vadd.f32 %v254_v61, %v135_v63  ;;  %v260_v51 = vmax.f32 %v213_v49, 0.0  ;;  %v288_v61 = vld [vmem:[%s863_s3 + $0x60] sm:$0xff]  ;;  %v289_v63 = vld [vmem:[%s863_s3 + $0x68] sm:$0xff] }
  0xa4   :  { %v224_v62 = vpop.f32.mrf.mxu0 }
  0xa5   :  { %v274_v7 = vmax.f32 %v255_v0, 0.0  ;;  %v225_v37 = vadd.f32 %v224_v62, %v85_v29  ;;  %v281_v62 = vld [vmem:[%s863_s3 + $0x28] sm:$0xff]  ;;  %v282_v0 = vld [vmem:[%s863_s3 + $0x30] sm:$0xff] }
  0xa7   :  { %v264_v44 = vmax.f32 %v225_v37, 0.0 }
  0xaa   :  { %v257_v1 = vpop.f32.mrf.mxu2 }
  0xab   :  { %v258_v3 = vadd.f32 %v257_v1, %v140_v59  ;;  %v287_v59 = vld [vmem:[%s863_s3 + $0x58] sm:$0xff]  ;;  %v290_v1 = vld [vmem:[%s863_s3 + $0x70] sm:$0xff] }
  0xac   :  { %v227_v5 = vpop.f32.mrf.mxu0 }
  0xad   :  { %v275_v8 = vmax.f32 %v258_v3, 0.0  ;;  %v228_v35 = vadd.f32 %v227_v5, %v90_v26  ;;  %v291_v3 = vld [vmem:[%s863_s3 + $0x78] sm:$0xff] }
  0xaf   :  { %388 = vmatpush.msra.mxu1 %v275_v8  ;;  %533 = vmatpush.msra.mxu3 %v275_v8  ;;  %v265_v41 = vmax.f32 %v228_v35, 0.0 }
  0xb1   :  { %389 = vmatpush.msra.mxu1 %v274_v7  ;;  %534 = vmatpush.msra.mxu3 %v274_v7 }
  0xb3   :  { %390 = vmatpush.msra.mxu1 %v273_v9  ;;  %535 = vmatpush.msra.mxu3 %v273_v9 }
  0xb4   :  { %v230_v13 = vpop.f32.mrf.mxu0 }
  0xb5   :  { %391 = vmatpush.msra.mxu1 %v272_v12  ;;  %536 = vmatpush.msra.mxu3 %v272_v12  ;;  %v231_v33 = vadd.f32 %v230_v13, %v95_v22  ;;  %v386_v13 = vpop.permute.xlu1 %385 }
  0xb7   :  { %392 = vmatpush.msra.mxu1 %v271_v14  ;;  %537 = vmatpush.msra.mxu3 %v271_v14  ;;  %v266_v38 = vmax.f32 %v231_v33, 0.0 }
  0xbc   :  { %v233_v15 = vpop.f32.mrf.mxu0 }
  0xbd   :  { %v234_v30 = vadd.f32 %v233_v15, %v100_v21  ;;  %v381_v15 = vpop.permute.xlu2 %380 }
  0xbf   :  { %v267_v36 = vmax.f32 %v234_v30, 0.0 }
  0xc4   :  { %v236_v17 = vpop.f32.mrf.mxu0 }
  0xc5   :  { %v237_v27 = vadd.f32 %v236_v17, %v105_v19  ;;  %v376_v17 = vpop.permute.xlu0 %375  ;;  %v366_v21 = vpop.permute.xlu2 %365 }
  0xc7   :  { %v268_v34 = vmax.f32 %v237_v27, 0.0 }
  0xcc   :  { %v239_v20 = vpop.f32.mrf.mxu0 }
  0xcd   :  { %v240_v24 = vadd.f32 %v239_v20, %v110_v18  ;;  %v371_v18 = vpop.permute.xlu1 %370  ;;  %v361_v22 = vpop.permute.xlu0 %360 }
  0xce   :  { %v351_v30 = vpop.permute.xlu2 %350 }
  0xcf   :  { %v269_v31 = vmax.f32 %v240_v24, 0.0 }
  0xd4   :  { %v242_v23 = vpop.f32.mrf.mxu0 }
  0xd5   :  { %v243_v25 = vadd.f32 %v242_v23, %v115_v16  ;;  %v356_v23 = vpop.permute.xlu1 %355  ;;  %v346_v33 = vpop.permute.xlu0 %345 }
  0xd7   :  { %v270_v28 = vmax.f32 %v243_v25, 0.0 }
  0xd9   :  { %393 = vmatpush.msra.mxu1 %v270_v28  ;;  %538 = vmatpush.msra.mxu3 %v270_v28 }
  0xdb   :  { %394 = vmatpush.msra.mxu1 %v269_v31  ;;  %539 = vmatpush.msra.mxu3 %v269_v31 }
  0xdd   :  { %395 = vmatpush.msra.mxu1 %v268_v34  ;;  %540 = vmatpush.msra.mxu3 %v268_v34 }
  0xdf   :  { %396 = vmatpush.msra.mxu1 %v267_v36  ;;  %541 = vmatpush.msra.mxu3 %v267_v36  ;;  %v341_v36 = vpop.permute.xlu1 %340 }
  0xe1   :  { %397 = vmatpush.msra.mxu1 %v266_v38  ;;  %542 = vmatpush.msra.mxu3 %v266_v38 }
  0xe3   :  { %398 = vmatpush.msra.mxu1 %v265_v41  ;;  %543 = vmatpush.msra.mxu3 %v265_v41 }
  0xe5   :  { %399 = vmatpush.msra.mxu1 %v264_v44  ;;  %544 = vmatpush.msra.mxu3 %v264_v44  ;;  %v336_v44 = vpop.permute.xlu2 %335 }
  0xe7   :  { %400 = vmatpush.msra.mxu1 %v263_v47  ;;  %545 = vmatpush.msra.mxu3 %v263_v47  ;;  %v331_v47 = vpop.permute.xlu0 %330 }
  0xe9   :  { %401 = vmatpush.msra.mxu1 %v262_v48  ;;  %546 = vmatpush.msra.mxu3 %v262_v48 }
  0xeb   :  { %402 = vmatpush.msra.mxu1 %v261_v50  ;;  %547 = vmatpush.msra.mxu3 %v261_v50  ;;  %v326_v50 = vpop.permute.xlu1 %325 }
  0xed   :  { %403 = vmatpush.msra.mxu1 %v260_v51  ;;  %548 = vmatpush.msra.mxu3 %v260_v51 }
  0xee   :  { %404 = vmatmul.f32.vlgmr.msra.gmra.mxu1 %v276_v53  ;;  %428 = vmatmul.f32.vlgmr.msra.gmra.mxu3 %v284_v54 }
  0xf6   :  { %407 = vmatmul.f32.gmra.mxu1 %v277_v52  ;;  %431 = vmatmul.f32.gmra.mxu3 %v285_v55 }
  0xfe   :  { %410 = vmatmul.f32.gmra.mxu1 %v278_v56  ;;  %434 = vmatmul.f32.gmra.mxu3 %v286_v57  ;;  %v321_v57 = vpop.permute.xlu2 %320 }
 0x106   :  { %413 = vmatmul.f32.gmra.mxu1 %v279_v58  ;;  %437 = vmatmul.f32.gmra.mxu3 %v287_v59 }
 0x10e   :  { %416 = vmatmul.f32.gmra.mxu1 %v280_v60  ;;  %440 = vmatmul.f32.gmra.mxu3 %v288_v61  ;;  %v316_v60 = vpop.permute.xlu0 %315 }
 0x116   :  { %419 = vmatmul.f32.gmra.mxu1 %v281_v62  ;;  %443 = vmatmul.f32.gmra.mxu3 %v289_v63  ;;  %v311_v63 = vpop.permute.xlu1 %310 }
 0x11e   :  { %422 = vmatmul.f32.gmra.mxu1 %v282_v0  ;;  %446 = vmatmul.f32.gmra.mxu3 %v290_v1 }
 0x126   :  { %425 = vmatmul.f32.gmra.mxu1 %v283_v2  ;;  %449 = vmatmul.f32.gmra.mxu3 %v291_v3 }
 0x16b   :  { %v848_v4 = vpop.f32.mrf.mxu1 }
 0x16c   :  { %v406_v0 = vadd.f32 %v848_v4, %v311_v63 }
 0x16e   :  { %v453_v3 = vmax.f32 %v406_v0, 0.0 }
 0x171   :  { %v429_v5 = vpop.f32.mrf.mxu3 }
 0x172   :  { %v430_v42 = vadd.f32 %v429_v5, %v351_v30  ;;  %v469_v5 = vld [vmem:[%s865_s5] sm:$0x1] }
 0x173   :  { %v850_v6 = vpop.f32.mrf.mxu1 }
 0x174   :  { %v461_v48 = vmax.f32 %v430_v42, 0.0  ;;  %v409_v61 = vadd.f32 %v850_v6, %v316_v60 }
 0x176   :  { %v454_v2 = vmax.f32 %v409_v61, 0.0 }
 0x179   :  { %v432_v7 = vpop.f32.mrf.mxu3 }
 0x17a   :  { %v433_v39 = vadd.f32 %v432_v7, %v356_v23  ;;  %v474_v7 = vpop.permute.xlu2 %473 }
 0x17b   :  { %v411_v9 = vpop.f32.mrf.mxu1  ;;  %v476_v4 = vperm.slane %v474_v7, 0 }
 0x17c   :  { %v462_v45 = vmax.f32 %v433_v39, 0.0  ;;  %v412_v58 = vadd.f32 %v411_v9, %v321_v57 }
 0x17e   :  { %v455_v1 = vmax.f32 %v412_v58, 0.0 }
 0x181   :  { %v435_v8 = vpop.f32.mrf.mxu3 }
 0x182   :  { %v436_v37 = vadd.f32 %v435_v8, %v361_v22 }
 0x183   :  { %v414_v11 = vpop.f32.mrf.mxu1 }
 0x184   :  { %v463_v43 = vmax.f32 %v436_v37, 0.0  ;;  %v415_v55 = vadd.f32 %v414_v11, %v326_v50 }
 0x186   :  { %v456_v62 = vmax.f32 %v415_v55, 0.0 }
 0x189   :  { %v438_v10 = vpop.f32.mrf.mxu3 }
 0x18a   :  { %v439_v34 = vadd.f32 %v438_v10, %v366_v21 }
 0x18b   :  { %v417_v14 = vpop.f32.mrf.mxu1 }
 0x18c   :  { %v464_v40 = vmax.f32 %v439_v34, 0.0  ;;  %v418_v54 = vadd.f32 %v417_v14, %v331_v47 }
 0x18e   :  { %v457_v59 = vmax.f32 %v418_v54, 0.0 }
 0x191   :  { %v441_v12 = vpop.f32.mrf.mxu3 }
 0x192   :  { %v442_v31 = vadd.f32 %v441_v12, %v371_v18 }
 0x193   :  { %v420_v19 = vpop.f32.mrf.mxu1 }
 0x194   :  { %v465_v38 = vmax.f32 %v442_v31, 0.0  ;;  %v421_v51 = vadd.f32 %v420_v19, %v336_v44 }
 0x196   :  { %v458_v56 = vmax.f32 %v421_v51, 0.0 }
 0x199   :  { %v444_v16 = vpop.f32.mrf.mxu3 }
 0x19a   :  { %v445_v28 = vadd.f32 %v444_v16, %v376_v17 }
 0x19b   :  { %v423_v27 = vpop.f32.mrf.mxu1 }
 0x19c   :  { %v466_v35 = vmax.f32 %v445_v28, 0.0  ;;  %v424_v49 = vadd.f32 %v423_v27, %v341_v36 }
 0x19e   :  { %v459_v52 = vmax.f32 %v424_v49, 0.0 }
 0x1a1   :  { %v447_v20 = vpop.f32.mrf.mxu3 }
 0x1a2   :  { %v448_v25 = vadd.f32 %v447_v20, %v381_v15 }
 0x1a3   :  { %v426_v41 = vpop.f32.mrf.mxu1 }
 0x1a4   :  { %v467_v32 = vmax.f32 %v448_v25, 0.0  ;;  %v427_v46 = vadd.f32 %v426_v41, %v346_v33 }
 0x1a6   :  { %v460_v53 = vmax.f32 %v427_v46, 0.0 }
 0x1a9   :  { %v450_v24 = vpop.f32.mrf.mxu3 }
 0x1aa   :  { %v451_v26 = vadd.f32 %v450_v24, %v386_v13 }
 0x1ac   :  { %v468_v29 = vmax.f32 %v451_v26, 0.0 }
 0x1ae   :  { %477 = vmatpush.msrb.mxu2 %v468_v29 }
 0x1b0   :  { %478 = vmatpush.msrb.mxu2 %v467_v32 }
 0x1b2   :  { %479 = vmatpush.msrb.mxu2 %v466_v35 }
 0x1b4   :  { %480 = vmatpush.msrb.mxu2 %v465_v38 }
 0x1b6   :  { %481 = vmatpush.msrb.mxu2 %v464_v40 }
 0x1b8   :  { %482 = vmatpush.msrb.mxu2 %v463_v43 }
 0x1ba   :  { %483 = vmatpush.msrb.mxu2 %v462_v45 }
 0x1bc   :  { %484 = vmatpush.msrb.mxu2 %v461_v48 }
 0x1be   :  { %485 = vmatpush.msrb.mxu2 %v460_v53 }
 0x1c0   :  { %486 = vmatpush.msrb.mxu2 %v459_v52 }
 0x1c2   :  { %487 = vmatpush.msrb.mxu2 %v458_v56 }
 0x1c4   :  { %488 = vmatpush.msrb.mxu2 %v457_v59 }
 0x1c6   :  { %489 = vmatpush.msrb.mxu2 %v456_v62 }
 0x1c8   :  { %490 = vmatpush.msrb.mxu2 %v455_v1 }
 0x1ca   :  { %491 = vmatpush.msrb.mxu2 %v454_v2 }
 0x1cc   :  { %492 = vmatpush.msrb.mxu2 %v453_v3 }
 0x1cd   :  { %493 = vmatmul.f32.vlgmr.msrb.gmra.mxu2 %v469_v5 }
 0x250   :  { %v494_v6 = vpop.f32.mrf.mxu2 }
 0x251   :  { %v495_v8 = vadd.f32 %v494_v6, %v476_v4 }
 0x253   :  { %498 = vst.msk [vmem:[#allocation3] sm:$0x1] %vm497_vm2, %v495_v8 }
 0x254   :  { %509 = dma.vmem_to_hbm [thread:$0]  %s505_s26, 16, %s507_s29, [#allocation4]  }
 0x255   :  { %578 = dma.done.wait [#allocation4], 16  }
 0x256   :  { %579 = vsyncadd [#allocation4], 4294967280 }
 0x257   :  { %514 = vsyncpa [#allocation4], 1 }

</bundles_post_ra>
